<compile_context>
chip_gen: v6e
topology: v6e:2x2x1
jax: 0.10.0
libtpu: 0.0.40
codegen_flags: <defaults>
</compile_context>

<pallas_src>
import jax
import jax.numpy as jnp
from jax.experimental import pallas as pl
from jax.experimental.pallas import tpu as pltpu

_CHUNK_THRESHOLD_BYTES = 8 * 1024 * 1024   # below this, a single DMA is plenty
_MAX_CHUNKS = 4                            # modest issue overlap for big copies


def identity(x: jax.Array) -> jax.Array:
    """Exact Identity forward. No kernel launched: zero HBM traffic, zero cost."""
    return x


def _make_dma_copy_kernel(chunks):
    """Kernel factory: whole-ref HBM->HBM copy as `len(chunks)` static DMAs along axis 0."""
    single_full = len(chunks) == 1

    def kernel(x_hbm, o_hbm, sems):
        if single_full:
            cp = pltpu.make_async_copy(x_hbm, o_hbm, sems.at[0])
            cp.start()
            cp.wait()
            return
        copies = []
        for idx, (start, size) in enumerate(chunks):   # static Python loop
            cp = pltpu.make_async_copy(
                x_hbm.at[pl.ds(start, size)],
                o_hbm.at[pl.ds(start, size)],
                sems.at[idx],
            )
            cp.start()
            copies.append(cp)
        for cp in copies:
            cp.wait()

    return kernel


def identity_pallas(x: jax.Array) -> jax.Array:
    """Identity forward materialised as a fresh copy via a direct HBM->HBM DMA."""
    if x.size == 0:
        return x

    orig_shape = x.shape
    xr = x.reshape(1) if x.ndim == 0 else x

    itemsize = jnp.dtype(xr.dtype).itemsize
    total_bytes = xr.size * itemsize
    dim0 = xr.shape[0]

    if total_bytes >= _CHUNK_THRESHOLD_BYTES and dim0 >= 2:
        num_chunks = min(_MAX_CHUNKS, dim0)
    else:
        num_chunks = 1

    # Static (start, size) chunk descriptors along axis 0.
    base, rem = divmod(dim0, num_chunks)
    chunks, start = [], 0
    for c in range(num_chunks):
        size = base + (1 if c < rem else 0)
        chunks.append((start, size))
        start += size

    out = pl.pallas_call(
        _make_dma_copy_kernel(chunks),
        out_shape=jax.ShapeDtypeStruct(xr.shape, xr.dtype),
        # Raw HBM refs on both sides: the DMA engine streams at HBM roofline with
        # zero TensorCore work; no VMEM staging buffers, no grid-step overhead.
        in_specs=[pl.BlockSpec(memory_space=pl.ANY)],
        out_specs=pl.BlockSpec(memory_space=pl.ANY),
        scratch_shapes=[pltpu.SemaphoreType.DMA((num_chunks,))],
        # Purely memory bound: read + write the whole array once.
        cost_estimate=pl.CostEstimate(
            flops=0, transcendentals=0, bytes_accessed=2 * total_bytes
        ),
    )(xr)

    return out.reshape(orig_shape)


if __name__ == "__main__":
    key = jax.random.PRNGKey(0)
    # NCHW input consistent with the module's usage: batch=2, channels=4, spatial=16x16.
    x = jax.random.normal(key, (2, 4, 16, 16), dtype=jnp.float32)

    # Materialised-copy path (runs the Pallas DMA kernel once).
    y = identity_pallas(x)
    y = jax.block_until_ready(y)

    assert y.shape == x.shape, f"shape mismatch {y.shape} vs {x.shape}"
    assert y.dtype == x.dtype, f"dtype mismatch {y.dtype} vs {x.dtype}"
    assert bool(jnp.all(y == x)), "identity output does not match input"

    # Zero-cost path (the recommended way to use Identity): no kernel at all.
    assert identity(x) is x

    print("KERNEL_OK")
</pallas_src>

<mosaic_0001>
module attributes {stable_mosaic.version = 11 : i64} {
  func.func @kernel(%arg0: memref<2x4x16x16xf32, #tpu.memory_space<any>>, %arg1: memref<2x4x16x16xf32, #tpu.memory_space<any>>, %arg2: memref<1x!tpu.dma_semaphore, #tpu.memory_space<semaphore_mem>>) attributes {dimension_semantics = [], scalar_prefetch = 0 : i64, scratch_operands = 1 : i64, tpu.core_type = #tpu.core_type<tc>} {
    %c0_i32 = arith.constant 0 : i32
    %0 = tpu.memref_slice %arg2[%c0_i32] : memref<1x!tpu.dma_semaphore, #tpu.memory_space<semaphore_mem>> -> memref<1x!tpu.dma_semaphore, #tpu.memory_space<semaphore_mem>>
    %1 = tpu.memref_squeeze %0 : memref<1x!tpu.dma_semaphore, #tpu.memory_space<semaphore_mem>> -> memref<!tpu.dma_semaphore, #tpu.memory_space<semaphore_mem>>
    tpu.enqueue_dma source(%arg0 : memref<2x4x16x16xf32, #tpu.memory_space<any>>) target(%arg1 : memref<2x4x16x16xf32, #tpu.memory_space<any>>) target_semaphore(%1 : memref<!tpu.dma_semaphore, #tpu.memory_space<semaphore_mem>>)
    %c0_i32_0 = arith.constant 0 : i32
    %2 = tpu.memref_slice %arg2[%c0_i32_0] : memref<1x!tpu.dma_semaphore, #tpu.memory_space<semaphore_mem>> -> memref<1x!tpu.dma_semaphore, #tpu.memory_space<semaphore_mem>>
    %3 = tpu.memref_squeeze %2 : memref<1x!tpu.dma_semaphore, #tpu.memory_space<semaphore_mem>> -> memref<!tpu.dma_semaphore, #tpu.memory_space<semaphore_mem>>
    tpu.wait_dma2 semaphore(%3 : memref<!tpu.dma_semaphore, #tpu.memory_space<semaphore_mem>>) src(%arg0 : memref<2x4x16x16xf32, #tpu.memory_space<any>>) dst(%arg1 : memref<2x4x16x16xf32, #tpu.memory_space<any>>)
    return
  }
}

</mosaic_0001>

<bundles_post_ra>
// kernel: tpu_custom_call.1
= control target key start
LH: loop header
LB: loop body
LE: loop exit
PB: predicated region body
PF: predicated region fallthrough
CT: control target
= control target key end

     0   :  { %s30_s6 = smov [#allocation2]   ;;  %s31_s7 = smov 131072   ;;  %s49_s0 = inlined_call_operand.hbm [shape: f32[2,4,16,16], index: 0, kind: input, shape index: {}]   ;;  %s50_s1 = inlined_call_operand.hbm [shape: f32[2,4,16,16], index: 1, kind: output, shape index: {}]  }
   0x1   :  { %s32_s8 = smov 0  }
   0x2   :  { %12 = dma.general %s49_s0, 2048, %s50_s1, %s30_s6, %s31_s7, [#allocation4], %s32_s8, 0  }
   0x3   :  { %28 = dma.done.wait [#allocation2], 2048 }
   0x4   :  { %29 = vsyncadd [#allocation2], 4294965248 }
   0x5   :  { %18 = vsyncmov [#allocation2] }
   0x8   :  { %s19_s13 = vpop.sfrf %18 }
   0x9   :  { %p24_p0 = scmp.ne.s32.totalorder %s19_s13, 0 }
   0xb   :  { %23 = shalt.err (%p24_p0)  }

</bundles_post_ra>
